<compile_context>
chip_gen: v6e
topology: v6e:2x2x1
jax: 0.10.0
libtpu: 0.0.40
codegen_flags: <defaults>
</compile_context>

<pallas_src>
import numpy as np
import jax
import jax.numpy as jnp
from jax.experimental import pallas as pl
from jax.experimental.pallas import tpu as pltpu


def _round_up(a, m):
    return ((a + m - 1) // m) * m


def _cdiv(a, b):
    return (a + b - 1) // b


def _build_fused_operator(H, W):
    """Fold the full ASAP pipeline into one real (H*W, Ho*Wo) matrix (exact)."""
    # F.pad amounts, computed from the *unpadded* sizes (as in the module).
    pt, pb = int(H / 2 - 1), int(H / 2)
    pleft, pright = int(W / 2 - 1), int(W / 2)
    H2, W2 = H + pt + pb, W + pleft + pright

    wh = np.abs(np.hamming(H2))
    ww = np.abs(np.hamming(W2))

    # low-band crop of the fftshifted spectrum
    h0, h1 = int(H2 / 4), int(H2 / 4 * 3)
    w0, w1 = int(W2 / 4), int(W2 / 4 * 3)
    Hl, Wl = h1 - h0, w1 - w0

    kH, kW = np.arange(H2), np.arange(W2)
    # forward DFT with norm='forward' (1/(H2*W2)) split across the two axes
    DH = np.exp(-2j * np.pi * np.outer(kH, kH) / H2) / H2
    DW = np.exp(-2j * np.pi * np.outer(kW, kW) / W2) / W2

    # fftshift rows -> crop low band -> bake in ifftshift; keep only the
    # columns hit by the original (nonzero) HxW block of the padded input.
    A = np.fft.ifftshift(np.fft.fftshift(DH, axes=0)[h0:h1, :], axes=0)[:, pt:pt + H]        # (Hl, H)
    B = np.fft.ifftshift(np.fft.fftshift(DW, axes=0)[w0:w1, :], axes=0)[:, pleft:pleft + W]  # (Wl, W)

    # Hamming window: sqrt(outer(wh, ww)) is rank-1, and crop + ifftshift are
    # per-axis permutations, so the cropped/shifted window stays rank-1.
    wh_c = np.fft.ifftshift(np.sqrt(wh)[h0:h1])
    ww_c = np.fft.ifftshift(np.sqrt(ww)[w0:w1])
    Wc = np.fft.ifftshift(np.sqrt(np.outer(wh, ww))[h0:h1, w0:w1], axes=(0, 1))
    assert np.allclose(np.outer(wh_c, ww_c), Wc), "rank-1 window fold mismatch"

    # inverse DFT (norm='forward' => unscaled inverse) with baked output crop
    mH, mW = np.arange(Hl), np.arange(Wl)
    Cc = np.exp(2j * np.pi * np.outer(mH, mH) / Hl)[int(Hl / 4):int(3 * Hl / 4), :]  # (Ho, Hl)
    Ec = np.exp(2j * np.pi * np.outer(mW, mW) / Wl)[int(Wl / 4):int(3 * Wl / 4), :]  # (Wo, Wl)
    Ho, Wo = Cc.shape[0], Ec.shape[0]

    # out = Re[L @ x @ R]   with  L = Cc diag(wh_c) A,  R = B^T diag(ww_c) Ec^T
    L = Cc @ (wh_c[:, None] * A)          # (Ho, H)  complex
    R = (B.T * ww_c[None, :]) @ Ec.T      # (W, Wo)  complex

    # single fused real operator (row-major flattening on both sides):
    #   out_flat = x_flat @ MT,   MT = Re(kron(L, R^T))^T
    MT = np.kron(L.real.T, R.real) - np.kron(L.imag.T, R.imag)      # (H*W, Ho*Wo)
    return MT.astype(np.float32), Ho, Wo


def _asap_matmul_kernel(x_ref, mt_ref, o_ref, acc_ref):
    @pl.when(pl.program_id(2) == 0)
    def _():
        acc_ref[...] = jnp.zeros_like(acc_ref)

    acc_ref[...] += jnp.dot(x_ref[...], mt_ref[...],
                            preferred_element_type=jnp.float32)

    @pl.when(pl.program_id(2) == pl.num_programs(2) - 1)
    def _():
        o_ref[...] = acc_ref[...].astype(o_ref.dtype)


def asap_padding_large(x, *, compute_dtype=jnp.bfloat16):
    """JAX/Pallas equivalent of ASAP_padding_large.forward. x: (N, C, H, W)."""
    # TODO(synk): for very large H*W the fused (H*W, Ho*Wo) operator stops
    # paying off; switch to a separable two-stage L/R matmul kernel there.
    N, C, H, W = x.shape
    MT_np, Ho, Wo = _build_fused_operator(H, W)

    BC = N * C
    K, P = H * W, Ho * Wo
    Kp, Pp = _round_up(K, 128), _round_up(P, 128)

    # zero-pad operator dims up to lane multiples (host-side, free)
    MT_pad = np.zeros((Kp, Pp), dtype=np.float32)
    MT_pad[:K, :P] = MT_np
    mt = jnp.asarray(MT_pad).astype(compute_dtype)

    # lane-dense input: (BC, H*W), zero-padded along K to match MT
    xf = x.reshape(BC, K).astype(compute_dtype)
    if Kp != K:
        xf = jnp.pad(xf, ((0, 0), (0, Kp - K)))

    # Batch tile: big enough to fill the MXU M-dim, but split so the grid has
    # >= 2 parallel batch steps when there is enough work (keeps both v7x TCs
    # busy; harmless on single-TC v5e/v6e).
    TM = 512
    if BC <= TM:
        TM = _round_up(max(BC, 8), 8)
        if BC >= 16:
            TM = _round_up(_cdiv(BC, 2), 8)
    TN = min(256, Pp)
    TK = min(512, Kp)
    grid = (_cdiv(BC, TM), Pp // TN, Kp // TK)

    # VMEM sizing: double-buffered bf16 in tiles + f32 out tiles + accumulator.
    bytes_c = np.dtype(compute_dtype).itemsize
    vmem_need = 2 * TM * TK * bytes_c + 2 * TK * TN * bytes_c + 3 * TM * TN * 4
    vmem_limit = int(min(max(4 * vmem_need, 32 * 1024 * 1024),
                         48 * 1024 * 1024))  # <= 48 MiB: safe on v7x's 64 MiB

    out = pl.pallas_call(
        _asap_matmul_kernel,
        out_shape=jax.ShapeDtypeStruct((BC, Pp), jnp.float32),
        grid_spec=pltpu.PrefetchScalarGridSpec(
            num_scalar_prefetch=0,
            grid=grid,
            in_specs=[
                pl.BlockSpec((TM, TK), lambda i, j, k: (i, k)),
                pl.BlockSpec((TK, TN), lambda i, j, k: (k, j)),
            ],
            out_specs=pl.BlockSpec((TM, TN), lambda i, j, k: (i, j)),
            scratch_shapes=[pltpu.VMEM((TM, TN), jnp.float32)],
        ),
        compiler_params=pltpu.CompilerParams(
            dimension_semantics=("parallel", "parallel", "arbitrary"),
            vmem_limit_bytes=vmem_limit,
        ),
    )(xf, mt)

    # strip lane padding, restore NCHW
    return out[:, :P].reshape(N, C, Ho, Wo)


def _numpy_reference(x):
    """Literal numpy port of the PyTorch forward (float64)."""
    N, C, H, W = x.shape
    pt, pb = int(H / 2 - 1), int(H / 2)
    plft, prt = int(W / 2 - 1), int(W / 2)
    xp = np.zeros((N, C, H + pt + pb, W + plft + prt), dtype=np.float64)
    xp[:, :, pt:pt + H, plft:plft + W] = x
    H2, W2 = xp.shape[2], xp.shape[3]
    win = np.sqrt(np.outer(np.abs(np.hamming(H2)), np.abs(np.hamming(W2))))
    low = np.fft.fftshift(np.fft.fft2(xp) / (H2 * W2))       # all axes, as torch
    low = low * win[None, None]
    low = low[:, :, int(H2 / 4):int(H2 / 4 * 3), int(W2 / 4):int(W2 / 4 * 3)]
    Hl, Wl = low.shape[2], low.shape[3]
    fc = np.fft.ifft2(np.fft.ifftshift(low)) * (Hl * Wl)     # norm='forward'
    fc = fc.real
    return fc[:, :, int(Hl / 4):int(3 * Hl / 4), int(Wl / 4):int(3 * Wl / 4)]


if __name__ == "__main__":
    key = jax.random.PRNGKey(0)
    x = jax.random.normal(key, (2, 4, 16, 16), dtype=jnp.float32)

    out = asap_padding_large(x)
    out = jax.block_until_ready(out)

    ref = _numpy_reference(np.asarray(x, dtype=np.float64))
    assert out.shape == ref.shape == (2, 4, 8, 8), (out.shape, ref.shape)
    err = float(np.max(np.abs(np.asarray(out, dtype=np.float64) - ref)))
    assert err < 1e-2, f"max abs error too large: {err}"
    print("KERNEL_OK")
</pallas_src>

<mosaic_0001>
module attributes {stable_mosaic.version = 11 : i64} {
  func.func @_asap_matmul_kernel(%arg0: i32, %arg1: i32, %arg2: i32, %arg3: memref<8x256xbf16, #tpu.memory_space<vmem>>, %arg4: memref<256x128xbf16, #tpu.memory_space<vmem>>, %arg5: memref<8x128xf32, #tpu.memory_space<vmem>>, %arg6: memref<8x128xf32, #tpu.memory_space<vmem>>) attributes {dimension_semantics = [#tpu.dimension_semantics<parallel>, #tpu.dimension_semantics<parallel>, #tpu.dimension_semantics<arbitrary>], iteration_bounds = array<i64: 1, 1, 1>, scalar_prefetch = 0 : i64, scratch_operands = 1 : i64, tpu.core_type = #tpu.core_type<tc>, window_params = [{transform_indices = @transform_0, window_bounds = array<i64: 8, 256>}, {transform_indices = @transform_1, window_bounds = array<i64: 256, 128>}, {transform_indices = @transform_2, window_bounds = array<i64: 8, 128>}]} {
    %c0_i32 = arith.constant 0 : i32
    %0 = arith.cmpi eq, %arg2, %c0_i32 : i32
    %1 = arith.extui %0 : i1 to i32
    %c0_i32_0 = arith.constant 0 : i32
    %2 = arith.cmpi ne, %1, %c0_i32_0 : i32
    scf.if %2 {
      %cst_10 = arith.constant 0.000000e+00 : f32
      %12 = vector.broadcast %cst_10 : f32 to vector<8x128xf32>
      %c0_11 = arith.constant 0 : index
      %c0_12 = arith.constant 0 : index
      %13 = vector.load %arg6[%c0_11, %c0_12] : memref<8x128xf32, #tpu.memory_space<vmem>>, vector<8x128xf32>
      tpu.vector_store %arg6[%c0_11, %c0_12], %12 {strides = array<i32>} : memref<8x128xf32, #tpu.memory_space<vmem>>, vector<8x128xf32>,
    } else {
    }
    %c0 = arith.constant 0 : index
    %c0_1 = arith.constant 0 : index
    %3 = vector.load %arg6[%c0, %c0_1] : memref<8x128xf32, #tpu.memory_space<vmem>>, vector<8x128xf32>
    %c0_2 = arith.constant 0 : index
    %c0_3 = arith.constant 0 : index
    %4 = vector.load %arg3[%c0_2, %c0_3] : memref<8x256xbf16, #tpu.memory_space<vmem>>, vector<8x256xbf16>
    %c0_4 = arith.constant 0 : index
    %c0_5 = arith.constant 0 : index
    %5 = vector.load %arg4[%c0_4, %c0_5] : memref<256x128xbf16, #tpu.memory_space<vmem>>, vector<256x128xbf16>
    %cst = arith.constant dense<0.000000e+00> : vector<8x128xf32>
    %6 = tpu.matmul %4, %5, %cst {dimension_numbers = #tpu.dot_dimension_numbers<[1], [0], [0], [1], [0, 0, 1, 1], [], []>} : vector<8x256xbf16>, vector<256x128xbf16>, vector<8x128xf32> -> vector<8x128xf32>
    %7 = arith.addf %3, %6 : vector<8x128xf32>
    %c0_6 = arith.constant 0 : index
    %c0_7 = arith.constant 0 : index
    %8 = vector.load %arg6[%c0_6, %c0_7] : memref<8x128xf32, #tpu.memory_space<vmem>>, vector<8x128xf32>
    tpu.vector_store %arg6[%c0_6, %c0_7], %7 {strides = array<i32>} : memref<8x128xf32, #tpu.memory_space<vmem>>, vector<8x128xf32>,
    %c0_i32_8 = arith.constant 0 : i32
    %9 = arith.cmpi eq, %arg2, %c0_i32_8 : i32
    %10 = arith.extui %9 : i1 to i32
    %c0_i32_9 = arith.constant 0 : i32
    %11 = arith.cmpi ne, %10, %c0_i32_9 : i32
    scf.if %11 {
      %c0_10 = arith.constant 0 : index
      %c0_11 = arith.constant 0 : index
      %12 = vector.load %arg6[%c0_10, %c0_11] : memref<8x128xf32, #tpu.memory_space<vmem>>, vector<8x128xf32>
      %c0_12 = arith.constant 0 : index
      %c0_13 = arith.constant 0 : index
      %13 = vector.load %arg5[%c0_12, %c0_13] : memref<8x128xf32, #tpu.memory_space<vmem>>, vector<8x128xf32>
      tpu.vector_store %arg5[%c0_12, %c0_13], %12 {strides = array<i32>} : memref<8x128xf32, #tpu.memory_space<vmem>>, vector<8x128xf32>,
    } else {
    }
    return
  }
  func.func @transform_0(%arg0: i32, %arg1: i32, %arg2: i32) -> (i32, i32) {
    %c0_i32 = arith.constant 0 : i32
    return %arg0, %arg2 : i32, i32
  }
  func.func @transform_1(%arg0: i32, %arg1: i32, %arg2: i32) -> (i32, i32) {
    %c0_i32 = arith.constant 0 : i32
    return %arg2, %arg1 : i32, i32
  }
  func.func @transform_2(%arg0: i32, %arg1: i32, %arg2: i32) -> (i32, i32) {
    %c0_i32 = arith.constant 0 : i32
    return %arg0, %arg1 : i32, i32
  }
}

</mosaic_0001>

<bundles_post_ra>
// kernel: tpu_custom_call.1
= control target key start
LH: loop header
LB: loop body
LE: loop exit
PB: predicated region body
PF: predicated region fallthrough
CT: control target
= control target key end

     0   :  { %7 = vsyncpa [#allocation4], 0  ;;  %s402_s0 = inlined_call_operand.hbm [shape: bf16[8,256], index: 0, kind: input, shape index: {}]   ;;  %s403_s1 = inlined_call_operand.hbm [shape: bf16[256,128], index: 1, kind: input, shape index: {}]   ;;  %s404_s2 = inlined_call_operand.hbm [shape: f32[8,128], index: 2, kind: output, shape index: {}]  }
   0x1   :  { %8 = vsyncpa [#allocation7], 0 }
   0x2   :  { %9 = vsyncpa [#allocation5], 0  ;;  %s373_s9 = smov [#allocation3]   ;;  %s374_s11 = smov [#allocation6]  }
   0x3   :  { %s16_s10 = sshll.u32 %s373_s9, 4  ;;  %s25_s12 = sshll.u32 %s374_s11, 4  ;;  %s17_s10 = int_to_ptr.vmem [resolvable:$true] %s16_s10  ;;  %s26_s12 = int_to_ptr.vmem [resolvable:$true] %s25_s12 }
   0x4   :  { %s315_s13 = scalar_lea.vmem %s17_s10, 128  ;;  %p320_p1 = scmp.lt.s32.totalorder %s17_s10, %s17_s10 }
   0x5   :  { %p316_p0 = scmp.ne.s32.totalorder %s17_s10, %s315_s13  ;;  %p321_p2 = scmp.lt.s32.totalorder %s315_s13, %s315_s13 }
   0x7   :  { %p322_p3 = por %p321_p2, %p320_p1 }
   0x9   :  { %p323_p4 = pnand %p322_p3, %p316_p0 }
   0xb   :  { %326 = shalt.err (!%p323_p4)
}
   0xc   :  { %19 = dma.hbm_to_vmem [thread:$0]  %s402_s0, 128, %s17_s10, [#allocation4]  }
   0xd   :  { %s335_s16 = scalar_lea.vmem %s26_s12, 2048  ;;  %p340_p6 = scmp.lt.s32.totalorder %s26_s12, %s26_s12 }
   0xe   :  { %p336_p5 = scmp.ne.s32.totalorder %s26_s12, %s335_s16  ;;  %p341_p7 = scmp.lt.s32.totalorder %s335_s16, %s335_s16 }
  0x10   :  { %p342_p8 = por %p341_p7, %p340_p6 }
  0x12   :  { %p343_p9 = pnand %p342_p8, %p336_p5 }
  0x14   :  { %346 = shalt.err (!%p343_p9)
}
  0x15   :  { %s375_s17 = smov 64   ;;  %s376_s18 = smov 4  }
  0x16   :  { %31 = dma.hbm_to_vmem [thread:$0]  %s403_s1, 2048, %s26_s12, [#allocation7], %s375_s17, %s375_s17, %s376_s18  }
  0x17   :  { %367 = dma.done.wait [#allocation4], 128  }
  0x18   :  { %368 = vsyncadd [#allocation4], 4294967168 }
  0x19   :  { %369 = dma.done.wait [#allocation7], 2048  }
  0x1a   :  { %370 = vsyncadd [#allocation7], 4294965248  ;;  %v289_v0 = vld [vmem:[#allocation6 + $0x78] sm:$0xff]   ;;  %v291_v2 = vld [vmem:[#allocation6 + $0x70] sm:$0xff]   ;;  %s377_s0 = smov [#allocation8]  }
  0x1b   :  { %v290_v1 = vld [vmem:[#allocation6 + $0x38] sm:$0xff]   ;;  %262 = vmatprep.subr.bf16.mxu0 %v289_v0  ;;  %v292_v3 = vld [vmem:[#allocation6 + $0x30] sm:$0xff]   ;;  %v293_v4 = vld [vmem:[#allocation6 + $0x68] sm:$0xff]   ;;  %s234_s1 = sshll.u32 %s377_s0, 4  ;;  %s235_s1 = int_to_ptr.vmem [resolvable:$true] %s234_s1 }
  0x1c   :  { %263 = vmatpush3.bf16.msra.mxu0 %v290_v1  ;;  %v294_v5 = vld [vmem:[#allocation6 + $0x28] sm:$0xff]   ;;  %v295_v6 = vld [vmem:[#allocation6 + $0x60] sm:$0xff]   ;;  %v297_v8 = vld [vmem:[#allocation6 + $0x58] sm:$0xff]   ;;  %s347_s21 = scalar_lea.vmem %s235_s1, 128  ;;  %p352_p11 = scmp.lt.s32.totalorder %s235_s1, %s235_s1 }
  0x1d   :  { %264 = vmatprep.subr.bf16.mxu0 %v291_v2  ;;  %v296_v7 = vld [vmem:[#allocation6 + $0x20] sm:$0xff]   ;;  %v298_v9 = vld [vmem:[#allocation6 + $0x18] sm:$0xff]   ;;  %v299_v10 = vld [vmem:[#allocation6 + $0x50] sm:$0xff]   ;;  %p348_p10 = scmp.ne.s32.totalorder %s235_s1, %s347_s21  ;;  %p353_p12 = scmp.lt.s32.totalorder %s347_s21, %s347_s21 }
  0x1e   :  { %v45_v11 = vld [vmem:[#allocation3] sm:$0xff]  ;;  %v300_v13 = vld [vmem:[#allocation6 + $0x10] sm:$0xff]   ;;  %v301_v14 = vld [vmem:[#allocation6 + $0x48] sm:$0xff]  }
  0x1f   :  { %v245_v12 = vcombine.high %v45_v11, %v45_v11  ;;  %v302_v15 = vld [vmem:[#allocation6 + $0x8] sm:$0xff]   ;;  %v303_v16 = vld [vmem:[#allocation6 + $0x40] sm:$0xff]   ;;  %v244_v18 = vcombine.low %v45_v11, %v45_v11  ;;  %p354_p13 = por %p353_p12, %p352_p11 }
  0x20   :  { %265 = vmatpush3.bf16.msra.mxu0 %v292_v3  ;;  %v304_v17 = vld [vmem:[#allocation6] sm:$0xff]  }
  0x21   :  { %266 = vmatprep.subr.bf16.mxu0 %v293_v4  ;;  %213 = vmatprep.mubr.bf16.mxu0 %v245_v12  ;;  %p355_p0 = pnand %p354_p13, %p348_p10 }
  0x24   :  { %267 = vmatpush3.bf16.msra.mxu0 %v294_v5 }
  0x25   :  { %268 = vmatprep.subr.bf16.mxu0 %v295_v6 }
  0x28   :  { %269 = vmatpush3.bf16.msra.mxu0 %v296_v7 }
  0x29   :  { %270 = vmatprep.subr.bf16.mxu0 %v297_v8 }
  0x2c   :  { %271 = vmatpush3.bf16.msra.mxu0 %v298_v9 }
  0x2d   :  { %272 = vmatprep.subr.bf16.mxu0 %v299_v10 }
  0x30   :  { %273 = vmatpush3.bf16.msra.mxu0 %v300_v13 }
  0x31   :  { %274 = vmatprep.subr.bf16.mxu0 %v301_v14 }
  0x34   :  { %275 = vmatpush3.bf16.msra.mxu0 %v302_v15 }
  0x35   :  { %276 = vmatprep.subr.bf16.mxu0 %v303_v16 }
  0x38   :  { %277 = vmatpush3.bf16.msra.mxu0 %v304_v17 }
  0x3b   :  { %214 = vmatmul.mubr.bf16.vlgmr.msra.gmra.mxu0 %v244_v18 }
  0xfb   :  { %v278_v19 = vpop.f32.mrf.mxu0 }
  0xfd   :  { %v279_v20 = vpop.f32.mrf.mxu0 }
  0xfe   :  { %v280_v21 = vadd.f32 %v279_v20, %v278_v19 }
  0xff   :  { %v281_v22 = vpop.f32.mrf.mxu0 }
 0x100   :  { %227 = vst [vmem:[#allocation8] sm:$0xff] %v280_v21 }
 0x101   :  { %v282_v23 = vpop.f32.mrf.mxu0 }
 0x102   :  { %358 = shalt.err (!%p355_p0)
}
 0x103   :  { %237 = dma.vmem_to_hbm [thread:$0]  %s235_s1, 128, %s404_s2, [#allocation5]  }
 0x104   :  { %371 = dma.done.wait [#allocation5], 128  }
 0x105   :  { %372 = vsyncadd [#allocation5], 4294967168 }
 0x106   :  { %241 = vsyncpa [#allocation4], 1 }
 0x107   :  { %242 = vsyncpa [#allocation7], 1 }
 0x108   :  { %243 = vsyncpa [#allocation5], 1 }

</bundles_post_ra>
